<compile_context>
chip_gen: v5e
topology: v5e:2x2
jax: 0.10.0
libtpu: 0.0.40
codegen_flags: <defaults>
</compile_context>

<pallas_src>
import jax
import jax.numpy as jnp
import numpy as np
from jax.experimental import pallas as pl
from jax.experimental.pallas import tpu as pltpu


def _round_up(x, m):
    return (x + m - 1) // m * m


def _get_act(name):
    name = name.lower()
    if name == "tanh":
        return jnp.tanh
    if name == "relu":
        return lambda v: jnp.maximum(v, 0.0)
    raise ValueError(f"unsupported activation {name}")


def _make_neurde_kernel(n_hidden, act_name):
    """Fused kernel: hidden alpha layers on a row tile, then exp(h @ Wf + brow)."""
    act = _get_act(act_name)

    def kernel(*refs):
        # refs = (u0_tile, Wf_tile, brow_tile, W_0, b_0, ..., W_{n-1}, b_{n-1}, out_tile)
        u0_ref, wf_ref, brow_ref = refs[0], refs[1], refs[2]
        out_ref = refs[-1]

        a = u0_ref[...]                                    # (tm, 4) bf16
        idx = 3
        for _ in range(n_hidden):
            w = refs[idx][...]                             # bf16 weight
            b = refs[idx + 1][...]                         # (1, d) f32 bias row
            idx += 2
            z = jnp.dot(a, w, preferred_element_type=jnp.float32) + b
            z = act(z)                                     # f32 on VPU/EUP
            a = z.astype(jnp.bfloat16)                     # back to bf16 for MXU

        # Fused last layer + einsum('bi,ni->bn') + exp, all in one dot.
        z = jnp.dot(a, wf_ref[...], preferred_element_type=jnp.float32) \
            + brow_ref[...]
        out_ref[...] = jnp.exp(z).astype(out_ref.dtype)

    return kernel


def neurde_forward(u0, grid, alpha_params, phi_params, activation="tanh",
                   tm=2048, tn=512, out_dtype=jnp.float32):
    """Pallas implementation of NeurDE.forward(u0, grid).

    u0:   (B, 4, H, W) float32 (NCHW, same as PyTorch)
    grid: (N, grid_dim) float32
    returns: (B*H*W, N) out_dtype
    """
    B, C, H, W = u0.shape
    assert C == 4, "NeurDE reshapes channels to 4"
    M = B * H * W
    N = grid.shape[0]
    act = _get_act(activation)

    # --- glue: identical to u0.permute(0,2,3,1).reshape(-1, 4) in PyTorch ---
    u0_flat = jnp.transpose(u0, (0, 2, 3, 1)).reshape(M, 4)

    # --- phi MLP hoisted to the wrapper (plain JAX, tiny), f32 ---
    b_phi = grid.astype(jnp.float32)
    for j, (w, bias) in enumerate(phi_params):
        b_phi = b_phi @ w + bias
        if j != len(phi_params) - 1:
            b_phi = act(b_phi)

    # --- fold last (linear, no-activation) alpha layer into the phi side ---
    w_last, bias_last = alpha_params[-1]
    wf = w_last @ b_phi.T                                   # (d_h, N) f32
    brow = (bias_last @ b_phi.T).reshape(1, N)              # (1, N) f32
    d_h = wf.shape[0]

    # --- N padding / tiling: lane-dense, multiple of 256 (full MXU width) ---
    N_pad = _round_up(N, 256)
    if N_pad <= tn:
        tn_eff = N_pad
    else:
        tn_eff = _round_up(min(tn, N_pad), 256)
        N_pad = _round_up(N_pad, tn_eff)
    if N_pad != N:
        wf = jnp.pad(wf, ((0, 0), (0, N_pad - N)))
        brow = jnp.pad(brow, ((0, 0), (0, N_pad - N)))
    wf = wf.astype(jnp.bfloat16)
    brow = brow.astype(jnp.float32)

    # --- M padding / tiling (multiple of 16 for bf16 sublane packing);
    #     keep >= 2 grid steps along M so v7x's 2nd TensorCore gets work. ---
    tm_eff = max(16, min(_round_up(tm, 16), _round_up(M, 16)))
    M_pad = _round_up(M, tm_eff)
    if M_pad // tm_eff < 2 and M > 16:
        tm_eff = max(16, _round_up(pl.cdiv(M, 2), 16))
        M_pad = _round_up(M, tm_eff)
    if M_pad != M:
        u0_flat = jnp.pad(u0_flat, ((0, M_pad - M), (0, 0)))
    u0_bf16 = u0_flat.astype(jnp.bfloat16)

    grid_m = M_pad // tm_eff
    grid_n = N_pad // tn_eff

    # --- hidden alpha weights as bf16, biases as (1, d) f32 rows ---
    hidden_params = []
    for (w, bias) in alpha_params[:-1]:
        hidden_params.append(w.astype(jnp.bfloat16))
        hidden_params.append(bias.reshape(1, -1).astype(jnp.float32))

    kernel = _make_neurde_kernel(len(alpha_params) - 1, activation)

    in_specs = [
        pl.BlockSpec((tm_eff, 4), lambda i, j: (i, 0)),        # u0 rows (resident over j)
        pl.BlockSpec((d_h, tn_eff), lambda i, j: (0, j)),      # fused weights
        pl.BlockSpec((1, tn_eff), lambda i, j: (0, j)),        # fused bias row
    ]
    for p in hidden_params:
        in_specs.append(pl.BlockSpec(p.shape, lambda i, j: (0, 0)))  # resident
    out_specs = pl.BlockSpec((tm_eff, tn_eff), lambda i, j: (i, j))

    # --- explicit VMEM budget (lane-padded (tm,4) tile occupies tm x 128) ---
    out_itemsize = np.dtype(out_dtype).itemsize
    out_tile_b = tm_eff * tn_eff * out_itemsize
    u0_tile_b = tm_eff * 128 * 2
    wf_tile_b = d_h * tn_eff * 2
    brow_tile_b = 8 * tn_eff * 4
    small_b = sum(int(p.size) * p.dtype.itemsize for p in hidden_params)
    interm_b = 2 * tm_eff * tn_eff * 4 + 2 * tm_eff * 128 * 4
    vmem_limit = int(1.5 * (2 * (out_tile_b + u0_tile_b + wf_tile_b
                                 + brow_tile_b + small_b) + interm_b)) + (4 << 20)
    vmem_limit = min(max(vmem_limit, 32 << 20), 64 << 20)     # v7x has 64 MiB physical

    # --- advisory cost estimate for XLA scheduling ---
    hidden_flops_row = sum(2 * w.shape[0] * w.shape[1] for w, _ in alpha_params[:-1])
    hidden_widths = sum(w.shape[1] for w, _ in alpha_params[:-1])
    flops = M_pad * grid_n * hidden_flops_row + 2 * M_pad * d_h * N_pad
    transcendentals = M_pad * grid_n * hidden_widths + M_pad * N_pad
    bytes_accessed = (u0_bf16.size * 2
                      + int(wf.size) * 2 * grid_m
                      + int(brow.size) * 4 * grid_m
                      + small_b * grid_m * grid_n
                      + M_pad * N_pad * out_itemsize)

    out = pl.pallas_call(
        kernel,
        out_shape=jax.ShapeDtypeStruct((M_pad, N_pad), out_dtype),
        grid_spec=pltpu.PrefetchScalarGridSpec(
            num_scalar_prefetch=0,
            grid=(grid_m, grid_n),
            in_specs=in_specs,
            out_specs=out_specs,
        ),
        compiler_params=pltpu.CompilerParams(
            dimension_semantics=("parallel", "parallel"),
            vmem_limit_bytes=vmem_limit),
        cost_estimate=pl.CostEstimate(
            flops=int(flops),
            transcendentals=int(transcendentals),
            bytes_accessed=int(bytes_accessed)),
    )(u0_bf16, wf, brow, *hidden_params)

    return out[:M, :N]


def init_dense_params(key, layers):
    """Deterministic PyTorch-nn.Linear-style init (uniform +-1/sqrt(fan_in))."""
    params = []
    for j in range(len(layers) - 1):
        key, kw, kb = jax.random.split(key, 3)
        bound = 1.0 / np.sqrt(layers[j])
        w = jax.random.uniform(kw, (layers[j], layers[j + 1]),
                               jnp.float32, -bound, bound)
        b = jax.random.uniform(kb, (layers[j + 1],),
                               jnp.float32, -bound, bound)
        params.append((w, b))
    return params, key


def neurde_reference(u0, grid, alpha_params, phi_params, activation="tanh",
                     mirror_kernel=False):
    """Pure-JAX mirror of the PyTorch forward.

    mirror_kernel=True replays the kernel's algebra (last alpha layer folded
    into the phi side) and its bf16-at-matmul-boundary casting so it can be
    compared against the Pallas output with a tight tolerance.
    """
    act = _get_act(activation)
    B, C, H, W = u0.shape
    x = jnp.transpose(u0, (0, 2, 3, 1)).reshape(B * H * W, C)

    # phi in f32 (hoisted in the wrapper in both paths)
    b = grid.astype(jnp.float32)
    for j, (w, bias) in enumerate(phi_params):
        b = b @ w + bias
        if j != len(phi_params) - 1:
            b = act(b)

    if not mirror_kernel:
        a = x
        for j, (w, bias) in enumerate(alpha_params):
            a = a @ w + bias
            if j != len(alpha_params) - 1:
                a = act(a)
        return jnp.exp(jnp.einsum("bi,ni->bn", a, b))

    # mirror the kernel: fold + bf16 casting points
    w_last, bias_last = alpha_params[-1]
    wf = (w_last @ b.T).astype(jnp.bfloat16)                 # (d_h, N)
    brow = (bias_last @ b.T).astype(jnp.float32)             # (N,)
    a = x.astype(jnp.bfloat16)
    for (w, bias) in alpha_params[:-1]:
        z = jnp.dot(a, w.astype(jnp.bfloat16),
                    preferred_element_type=jnp.float32) + bias
        z = act(z)
        a = z.astype(jnp.bfloat16)
    z = jnp.dot(a, wf, preferred_element_type=jnp.float32) + brow
    return jnp.exp(z)


if __name__ == "__main__":
    # Small shapes consistent with the module: u0 is (B, 4, H, W), grid is (N, 2).
    B, H, W = 2, 16, 16          # -> M = 512 rows; tm is auto-capped to 256 => grid_m = 2
    N_GRID = 128                 # number of grid points (padded to 256 lanes)
    alpha_layer = [4, 32, 32, 16]
    phi_layer = [2, 32, 32, 16]
    activation = "tanh"

    key = jax.random.PRNGKey(0)
    key, k_u0, k_grid = jax.random.split(key, 3)
    u0 = jax.random.normal(k_u0, (B, 4, H, W), jnp.float32)
    grid = jax.random.uniform(k_grid, (N_GRID, phi_layer[0]), jnp.float32)

    alpha_params, key = init_dense_params(key, alpha_layer)
    phi_params, key = init_dense_params(key, phi_layer)

    # f32 output path (default)
    out = neurde_forward(u0, grid, alpha_params, phi_params,
                         activation=activation)
    out = jax.block_until_ready(out)
    assert out.shape == (B * H * W, N_GRID)

    # 1) Tight check against a reference mirroring the kernel's fold + bf16 casts.
    ref_mirror = neurde_reference(u0, grid, alpha_params, phi_params,
                                  activation=activation, mirror_kernel=True)
    np.testing.assert_allclose(np.asarray(out), np.asarray(ref_mirror),
                               rtol=1e-3, atol=1e-4)

    # 2) Relaxed check against the exact f32 PyTorch-equivalent forward
    #    (bf16 matmul operands => ~1% level deviations, amplified by exp).
    ref_f32 = neurde_reference(u0, grid, alpha_params, phi_params,
                               activation=activation, mirror_kernel=False)
    np.testing.assert_allclose(np.asarray(out), np.asarray(ref_f32),
                               rtol=1e-1, atol=5e-2)

    # 3) bf16 output path (halves store traffic of this writeback-bound kernel).
    out_bf16 = neurde_forward(u0, grid, alpha_params, phi_params,
                              activation=activation, out_dtype=jnp.bfloat16)
    out_bf16 = jax.block_until_ready(out_bf16)
    np.testing.assert_allclose(np.asarray(out_bf16, np.float32),
                               np.asarray(ref_mirror), rtol=2e-2, atol=2e-2)

    print("KERNEL_OK")
</pallas_src>

<mosaic_0001>
module attributes {stable_mosaic.version = 11 : i64} {
  func.func @kernel(%arg0: i32, %arg1: i32, %arg2: memref<256x4xbf16, #tpu.memory_space<vmem>>, %arg3: memref<32x256xbf16, #tpu.memory_space<vmem>>, %arg4: memref<1x256xf32, #tpu.memory_space<vmem>>, %arg5: memref<4x32xbf16, #tpu.memory_space<vmem>>, %arg6: memref<1x32xf32, #tpu.memory_space<vmem>>, %arg7: memref<32x32xbf16, #tpu.memory_space<vmem>>, %arg8: memref<1x32xf32, #tpu.memory_space<vmem>>, %arg9: memref<256x256xf32, #tpu.memory_space<vmem>>) attributes {dimension_semantics = [#tpu.dimension_semantics<parallel>, #tpu.dimension_semantics<parallel>], iteration_bounds = array<i64: 2, 1>, scalar_prefetch = 0 : i64, scratch_operands = 0 : i64, tpu.core_type = #tpu.core_type<tc>, window_params = [{transform_indices = @transform_0, window_bounds = array<i64: 256, 4>}, {transform_indices = @transform_1, window_bounds = array<i64: 32, 256>}, {transform_indices = @transform_2, window_bounds = array<i64: 1, 256>}, {pipeline_mode = #tpu.pipeline_mode<synchronous>, transform_indices = @transform_3, window_bounds = array<i64: 4, 32>}, {pipeline_mode = #tpu.pipeline_mode<synchronous>, transform_indices = @transform_4, window_bounds = array<i64: 1, 32>}, {pipeline_mode = #tpu.pipeline_mode<synchronous>, transform_indices = @transform_5, window_bounds = array<i64: 32, 32>}, {pipeline_mode = #tpu.pipeline_mode<synchronous>, transform_indices = @transform_6, window_bounds = array<i64: 1, 32>}, {transform_indices = @transform_7, window_bounds = array<i64: 256, 256>}]} {
    %c0 = arith.constant 0 : index
    %c0_0 = arith.constant 0 : index
    %0 = vector.load %arg2[%c0, %c0_0] : memref<256x4xbf16, #tpu.memory_space<vmem>>, vector<256x4xbf16>
    %c0_1 = arith.constant 0 : index
    %c0_2 = arith.constant 0 : index
    %1 = vector.load %arg5[%c0_1, %c0_2] : memref<4x32xbf16, #tpu.memory_space<vmem>>, vector<4x32xbf16>
    %c0_3 = arith.constant 0 : index
    %c0_4 = arith.constant 0 : index
    %2 = vector.load %arg6[%c0_3, %c0_4] : memref<1x32xf32, #tpu.memory_space<vmem>>, vector<1x32xf32>
    %cst = arith.constant dense<0.000000e+00> : vector<256x32xf32>
    %3 = tpu.matmul %0, %1, %cst {dimension_numbers = #tpu.dot_dimension_numbers<[1], [0], [0], [1], [0, 0, 1, 1], [], []>} : vector<256x4xbf16>, vector<4x32xbf16>, vector<256x32xf32> -> vector<256x32xf32>
    %4 = vector.broadcast %2 : vector<1x32xf32> to vector<256x32xf32>
    %5 = arith.addf %3, %4 : vector<256x32xf32>
    %6 = math.tanh %5 : vector<256x32xf32>
    %7 = arith.truncf %6 : vector<256x32xf32> to vector<256x32xbf16>
    %c0_5 = arith.constant 0 : index
    %c0_6 = arith.constant 0 : index
    %8 = vector.load %arg7[%c0_5, %c0_6] : memref<32x32xbf16, #tpu.memory_space<vmem>>, vector<32x32xbf16>
    %c0_7 = arith.constant 0 : index
    %c0_8 = arith.constant 0 : index
    %9 = vector.load %arg8[%c0_7, %c0_8] : memref<1x32xf32, #tpu.memory_space<vmem>>, vector<1x32xf32>
    %cst_9 = arith.constant dense<0.000000e+00> : vector<256x32xf32>
    %10 = tpu.matmul %7, %8, %cst_9 {dimension_numbers = #tpu.dot_dimension_numbers<[1], [0], [0], [1], [0, 0, 1, 1], [], []>} : vector<256x32xbf16>, vector<32x32xbf16>, vector<256x32xf32> -> vector<256x32xf32>
    %11 = vector.broadcast %9 : vector<1x32xf32> to vector<256x32xf32>
    %12 = arith.addf %10, %11 : vector<256x32xf32>
    %13 = math.tanh %12 : vector<256x32xf32>
    %14 = arith.truncf %13 : vector<256x32xf32> to vector<256x32xbf16>
    %c0_10 = arith.constant 0 : index
    %c0_11 = arith.constant 0 : index
    %15 = vector.load %arg3[%c0_10, %c0_11] : memref<32x256xbf16, #tpu.memory_space<vmem>>, vector<32x256xbf16>
    %cst_12 = arith.constant dense<0.000000e+00> : vector<256x256xf32>
    %16 = tpu.matmul %14, %15, %cst_12 {dimension_numbers = #tpu.dot_dimension_numbers<[1], [0], [0], [1], [0, 0, 1, 1], [], []>} : vector<256x32xbf16>, vector<32x256xbf16>, vector<256x256xf32> -> vector<256x256xf32>
    %c0_13 = arith.constant 0 : index
    %c0_14 = arith.constant 0 : index
    %17 = vector.load %arg4[%c0_13, %c0_14] : memref<1x256xf32, #tpu.memory_space<vmem>>, vector<1x256xf32>
    %18 = vector.broadcast %17 : vector<1x256xf32> to vector<256x256xf32>
    %19 = arith.addf %16, %18 : vector<256x256xf32>
    %20 = math.exp %19 : vector<256x256xf32>
    %c0_15 = arith.constant 0 : index
    %c0_16 = arith.constant 0 : index
    %21 = vector.load %arg9[%c0_15, %c0_16] : memref<256x256xf32, #tpu.memory_space<vmem>>, vector<256x256xf32>
    tpu.vector_store %arg9[%c0_15, %c0_16], %20 {strides = array<i32>} : memref<256x256xf32, #tpu.memory_space<vmem>>, vector<256x256xf32>,
    return
  }
  func.func @transform_0(%arg0: i32, %arg1: i32) -> (i32, i32) {
    %c0_i32 = arith.constant 0 : i32
    %c0_i32_0 = arith.constant 0 : i32
    return %arg0, %c0_i32 : i32, i32
  }
  func.func @transform_1(%arg0: i32, %arg1: i32) -> (i32, i32) {
    %c0_i32 = arith.constant 0 : i32
    %c0_i32_0 = arith.constant 0 : i32
    return %c0_i32, %arg1 : i32, i32
  }
  func.func @transform_2(%arg0: i32, %arg1: i32) -> (i32, i32) {
    %c0_i32 = arith.constant 0 : i32
    %c0_i32_0 = arith.constant 0 : i32
    return %c0_i32, %arg1 : i32, i32
  }
  func.func @transform_3(%arg0: i32, %arg1: i32) -> (i32, i32) {
    %c0_i32 = arith.constant 0 : i32
    %c0_i32_0 = arith.constant 0 : i32
    %c0_i32_1 = arith.constant 0 : i32
    return %c0_i32, %c0_i32_0 : i32, i32
  }
  func.func @transform_4(%arg0: i32, %arg1: i32) -> (i32, i32) {
    %c0_i32 = arith.constant 0 : i32
    %c0_i32_0 = arith.constant 0 : i32
    %c0_i32_1 = arith.constant 0 : i32
    return %c0_i32, %c0_i32_0 : i32, i32
  }
  func.func @transform_5(%arg0: i32, %arg1: i32) -> (i32, i32) {
    %c0_i32 = arith.constant 0 : i32
    %c0_i32_0 = arith.constant 0 : i32
    %c0_i32_1 = arith.constant 0 : i32
    return %c0_i32, %c0_i32_0 : i32, i32
  }
  func.func @transform_6(%arg0: i32, %arg1: i32) -> (i32, i32) {
    %c0_i32 = arith.constant 0 : i32
    %c0_i32_0 = arith.constant 0 : i32
    %c0_i32_1 = arith.constant 0 : i32
    return %c0_i32, %c0_i32_0 : i32, i32
  }
  func.func @transform_7(%arg0: i32, %arg1: i32) -> (i32, i32) {
    %c0_i32 = arith.constant 0 : i32
    return %arg0, %arg1 : i32, i32
  }
}

</mosaic_0001>

<bundles_post_ra>
// kernel: tpu_custom_call.1
= control target key start
LH: loop header
LB: loop body
LE: loop exit
PB: predicated region body
PF: predicated region fallthrough
CT: control target
= control target key end

     0   :  { %12 = vsyncpa [#allocation3], 0  ;;  %s2473_s0 = inlined_call_operand.vmem [shape: bf16[512,4], index: 0, kind: input, shape index: {}]   ;;  %s2474_s1 = inlined_call_operand.vmem [shape: bf16[32,256], index: 1, kind: input, shape index: {}]   ;;  %s2475_s2 = inlined_call_operand.vmem [shape: f32[1,256], index: 2, kind: input, shape index: {}]   ;;  %s2476_s3 = inlined_call_operand.vmem [shape: bf16[4,32], index: 3, kind: input, shape index: {}]   ;;  %s2477_s4 = inlined_call_operand.vmem [shape: f32[1,32], index: 4, kind: input, shape index: {}]   ;;  %s2478_s5 = inlined_call_operand.vmem [shape: bf16[32,32], index: 5, kind: input, shape index: {}]   ;;  %s2479_s6 = inlined_call_operand.vmem [shape: f32[1,32], index: 6, kind: input, shape index: {}]   ;;  %s2480_s7 = inlined_call_operand.hbm [shape: f32[512,256], index: 7, kind: output, shape index: {}]  }
   0x1   :  { %14 = vsyncpa [#allocation3 + $0x1], 0  ;;  %s2046_s24 = smov 0   ;;  %s2048_s25 = smov 0  }
   0x2   :  { %s2050_s26 = smov 0   ;;  %s2052_s27 = smov 0  }
   0x3   :  { %s2054_s28 = smov 0   ;;  %s2056_s29 = smov 0  }
   0x4 LB: > { %s1417_s30 = sadd.s32 4294967295, %s2002_s29   ;;  %s1418_s8 = sadd.s32 4294967294, %s2002_s29   ;;  %s2002_s29 = sphi %s2056_s29, %s20_s29   ;;  %s1998_s28 = sphi %s2054_s28, %s2487_s28   ;;  %s1994_s27 = sphi %s2052_s27, %s2486_s27   ;;  %s1990_s26 = sphi %s2050_s26, %s2485_s26   ;;  %s1986_s25 = sphi %s2048_s25, %s2484_s25   ;;  %s1982_s24 = sphi %s2046_s24, %s2483_s24  }
   0x5   : > { %s32_s9 = sadd.s32 1, %s1998_s28  ;;  %s203_s10 = sadd.s32 1, %s1990_s26 }
   0x6   : > { %p34_p0 = scmp.ge.s32.totalorder %s32_s9, 2  ;;  %p213_p1 = scmp.ne.s32.totalorder %s1990_s26, %s1986_s25 }
   0x7   : > { %p214_p2 = scmp.eq.s32.totalorder %s1417_s30, 1  ;;  %p219_p3 = scmp.ne.s32.totalorder %s1986_s25, %s1982_s24 }
   0x8   : > { %s2489_s9 = smov (%p34_p0, %s32_s9), 0  ;;  %p220_p5 = scmp.eq.s32.totalorder %s1418_s8, 1 }
   0x9   : > { %p2086_p4 = por %p214_p2, %p213_p1  ;;  %s198_s12 = ssub.s32 %s1998_s28, %s2489_s9 }
   0xa   : > { %p1423_p6 = scmp.ge.s32.totalorder %s2002_s29, 1  ;;  %p201_p7 = scmp.eq.s32.totalorder %s198_s12, 0 }
   0xb   : > { %p2093_p8 = por %p220_p5, %p219_p3  ;;  %p276_p9 = scmp.lt.s32.totalorder %s2002_s29, 3 }
   0xc   : > { %s2099_s14 = scalar_select %p201_p7, %s1990_s26, %s203_s10  }
   0xd   : > { %p277_p10 = pnand %p1423_p6, %p276_p9 }
   0xe   : > { %s1425_s17 = sshll.u32 (!%p277_p10), %s1994_s27, 5  ;;  %s314_s22 = sand.u32 (!%p277_p10), 1, %s1986_s25  }
   0xf   : > { %280 = sbr.rel (%p277_p10) target bundleno = 711 (0x2c7), region = 48  ;;  %p318_p11 = scmp.lt.s32.totalorder (!%p277_p10), %s1425_s17, 63 }
  0x10   : > { %s1424_s23 = sshll.u32 (!%p277_p10), %s314_s22, 9  ;;  %s1608_s8 = sshll.u32 (!%p277_p10), %s1994_s27, 9 }
  0x11   : > { %s2282_s30 = scalar_lea.vmem (!%p277_p10), [#allocation2], %s1424_s23  ;;  %s1313_s15 = scalar_lea.hbm (!%p277_p10), %s2480_s7, %s1608_s8 }
  0x12   : > { %s1314_s16 = sshll.u32 (!%p277_p10), %s2282_s30, 4  ;;  %s1299_s27 = scalar_lea.sflag (!%p277_p10), [#allocation3], %s314_s22  ;;  %s1315_s16 = int_to_ptr.vmem [resolvable:$true] %s1314_s16 }
  0x13   : > { %s1944_s23 = scalar_lea.hbm (!%p277_p10), %s2480_s7, 1024 }
  0x14   : > { %v369_v0 = vld [vmem:[%s2476_s3] sm:$0x3]  ;;  %vm503_vm0 = vcmask 1041408   ;;  %s2491_s17 = smov (!%p318_p11, %s1425_s17), 63  ;;  %vm454_vm1 = vcmask 31744   ;;  %v1602_v9 = vld [vmem:[%s2478_s5 + $0x8] sm:$0xff] }
  0x15   : > { %v505_v1 = vsel %vm503_vm0, %v369_v0, 0  ;;  %s1426_s18 = sshll.u32 %s2491_s17, 2  ;;  %719 = vmatpush.bf16.msra.mxu1 %v1602_v9  ;;  %v1601_v11 = vld [vmem:[%s2478_s5] sm:$0xff]  ;;  %vm664_vm2 = vcmask 261120   ;;  %s1316_s17 = sshll.u32 %s1313_s15, 4  ;;  %s1317_s17 = int_to_ptr.hbm [resolvable:$true] %s1316_s17 }
  0x16   : > { %514 = vmatpush.bf16.msra.mxu0 %v505_v1  ;;  %s2108_s21 = scalar_lea.vmem %s2473_s0, %s1426_s18  ;;  %v2136_v14 = vld [vmem:[%s2477_s4] ss:$0 sm:$0xff]  ;;  %s1938_s18 = sshra.s32 %s1317_s17, 4  ;;  %s1939_s18 = int_to_ptr.hbm [resolvable:$true] %s1938_s18 }
  0x17   : > { %v1585_v2 = vld [vmem:[%s2108_s21] sm:$0xff]  ;;  %v1586_v3 = vld [vmem:[%s2108_s21 + $0x8] sm:$0xff]  ;;  %v1587_v4 = vld [vmem:[%s2108_s21 + $0x10] sm:$0xff]  ;;  %s1940_s19 = scalar_lea.hbm %s1939_s18, 512  ;;  %p1945_p1 = scmp.lt.s32.totalorder %s1939_s18, %s2480_s7 }
  0x18   : > { %v1588_v5 = vld [vmem:[%s2108_s21 + $0x18] sm:$0xff]  ;;  %v1589_v6 = vld [vmem:[%s2108_s21 + $0x20] sm:$0xff]  ;;  %v1590_v7 = vld [vmem:[%s2108_s21 + $0x28] sm:$0xff]  ;;  %p1941_p12 = scmp.ne.s32.totalorder %s1939_s18, %s1940_s19  ;;  %p1946_p2 = scmp.lt.s32.totalorder %s1944_s23, %s1940_s19 }
  0x19   : > { %1491 = vmatmul.msk.bf16.vlgmr.msra.gmra.mxu0 %vm454_vm1, %v1585_v2  ;;  %v1591_v8 = vld [vmem:[%s2108_s21 + $0x30] sm:$0xff]  ;;  %v1592_v10 = vld [vmem:[%s2108_s21 + $0x38] sm:$0xff]  ;;  %720 = vmatpush.bf16.msra.mxu1 %v1601_v11  ;;  %v1593_v12 = vld [vmem:[%s2108_s21 + $0x40] sm:$0xff] }
  0x1a   : > { %v1594_v18 = vld [vmem:[%s2108_s21 + $0x48] sm:$0xff]  ;;  %v1595_v26 = vld [vmem:[%s2108_s21 + $0x50] sm:$0xff]  ;;  %v1596_v34 = vld [vmem:[%s2108_s21 + $0x58] sm:$0xff]  ;;  %p1942_p13 = pnand %p1941_p12, %p2086_p4  ;;  %p1947_p3 = por %p1946_p2, %p1945_p1 }
  0x1b   : > { %v1597_v42 = vld [vmem:[%s2108_s21 + $0x60] sm:$0xff]  ;;  %v1598_v50 = vld [vmem:[%s2108_s21 + $0x68] sm:$0xff]  ;;  %v1599_v58 = vld [vmem:[%s2108_s21 + $0x70] sm:$0xff] }
  0x1c   : > { %v1600_v2 = vld [vmem:[%s2108_s21 + $0x78] sm:$0xff]  ;;  %p1943_p0 = pneg %p1942_p13 }
  0x1d   : > { %v1606_v11 = vld [vmem:[%s2474_s1 + $0x14] sm:$0xf0] }
  0x1e   : > { %p1948_p5 = pnand %p1947_p3, %p1943_p0 }
  0x29   : > { %1492 = vmatmul.msk.bf16.gmra.mxu0 %vm454_vm1, %v1586_v3 }
  0x39   : > { %1493 = vmatmul.msk.bf16.gmra.mxu0 %vm454_vm1, %v1587_v4 }
  0x49   : > { %1494 = vmatmul.msk.bf16.gmra.mxu0 %vm454_vm1, %v1588_v5 }
  0x59   : > { %1495 = vmatmul.msk.bf16.gmra.mxu0 %vm454_vm1, %v1589_v6 }
  0x69   : > { %1496 = vmatmul.msk.bf16.gmra.mxu0 %vm454_vm1, %v1590_v7 }
  0x79   : > { %1497 = vmatmul.msk.bf16.gmra.mxu0 %vm454_vm1, %v1591_v8 }
  0x89   : > { %1498 = vmatmul.msk.bf16.gmra.mxu0 %vm454_vm1, %v1592_v10  ;;  %v1541_v10 = vld [vmem:[%s2474_s1 + $0x10] sm:$0xf] }
  0x96   : > { %v516_v13 = vpop.f32.mrf.mxu0 }
  0x97   : > { %v517_v15 = vadd.f32 %v2136_v14, %v516_v13  ;;  %v1542_v13 = vor.u32 %v1606_v11, %v1541_v10 }
  0x99   : > { %1499 = vmatmul.msk.bf16.gmra.mxu0 %vm454_vm1, %v1593_v12  ;;  %1668 = vtanh.f32 %v517_v15  ;;  %v1605_v12 = vld [vmem:[%s2474_s1 + $0x14] sm:$0xf]  ;;  %v1543_v15 = vld [vmem:[%s2474_s1 + $0x18] sm:$0xf0]  ;;  %934 = vmatpush.bf16.msra.mxu2 %v1542_v13 }
  0x9e   : > { %v518_v16 = vpop.f32.mrf.mxu0 }
  0x9f   : > { %v519_v17 = vadd.f32 %v2136_v14, %v518_v16  ;;  %v1669_v19 = vpop.eup %1668  ;;  %v1546_v16 = vor.u32 %v1605_v12, %v1543_v15 }
  0xa1   : > { %1670 = vtanh.f32 %v519_v17  ;;  %1023 = vmatpush.bf16.msra.mxu3 %v1546_v16  ;;  %v1533_v17 = vld [vmem:[%s2474_s1] sm:$0xf] }
  0xa6   : > { %v521_v20 = vpop.f32.mrf.mxu0 }
  0xa7   : > { %v1671_v21 = vpop.eup %1670  ;;  %v522_v23 = vadd.f32 %v2136_v14, %v521_v20 }
  0xa8   : > { %v628_v22 = vpack.c.bf16 %v1671_v21, %v1669_v19  ;;  %v1603_v19 = vld [vmem:[%s2474_s1 + $0x4] sm:$0xf] }
  0xa9   : > { %1500 = vmatmul.msk.bf16.gmra.mxu0 %vm454_vm1, %v1594_v18  ;;  %1672 = vtanh.f32 %v522_v23  ;;  %v1604_v18 = vld [vmem:[%s2474_s1 + $0x4] sm:$0xf0]  ;;  %v1535_v23 = vld [vmem:[%s2474_s1 + $0x8] sm:$0xf0] }
  0xaa   : > { %1515 = vmatmul.msk.bf16.vlgmr.msra.gmra.mxu1 %vm664_vm2, %v628_v22  ;;  %v1534_v22 = vor.u32 %v1604_v18, %v1533_v17 }
  0xac   : > { %935 = vmatpush.bf16.msra.mxu2 %v1534_v22 }
  0xae   : > { %v523_v24 = vpop.f32.mrf.mxu0 }
  0xaf   : > { %v524_v25 = vadd.f32 %v2136_v14, %v523_v24  ;;  %v1673_v27 = vpop.eup %1672 }
  0xb1   : > { %1674 = vtanh.f32 %v524_v25  ;;  %v1538_v25 = vor.u32 %v1603_v19, %v1535_v23 }
  0xb3   : > { %1024 = vmatpush.bf16.msra.mxu3 %v1538_v25 }
  0xb6   : > { %v526_v28 = vpop.f32.mrf.mxu0 }
  0xb7   : > { %v1675_v29 = vpop.eup %1674  ;;  %v527_v31 = vadd.f32 %v2136_v14, %v526_v28 }
  0xb8   : > { %v629_v30 = vpack.c.bf16 %v1675_v29, %v1673_v27 }
  0xb9   : > { %1501 = vmatmul.msk.bf16.gmra.mxu0 %vm454_vm1, %v1595_v26  ;;  %1676 = vtanh.f32 %v527_v31 }
  0xba   : > { %1516 = vmatmul.msk.bf16.gmra.mxu1 %vm664_vm2, %v629_v30 }
  0xbe   : > { %v528_v32 = vpop.f32.mrf.mxu0 }
  0xbf   : > { %v529_v33 = vadd.f32 %v2136_v14, %v528_v32  ;;  %v1677_v35 = vpop.eup %1676 }
  0xc1   : > { %1678 = vtanh.f32 %v529_v33 }
  0xc6   : > { %v531_v36 = vpop.f32.mrf.mxu0 }
  0xc7   : > { %v1679_v37 = vpop.eup %1678  ;;  %v532_v39 = vadd.f32 %v2136_v14, %v531_v36 }
  0xc8   : > { %v630_v38 = vpack.c.bf16 %v1679_v37, %v1677_v35 }
  0xc9   : > { %1502 = vmatmul.msk.bf16.gmra.mxu0 %vm454_vm1, %v1596_v34  ;;  %1680 = vtanh.f32 %v532_v39  ;;  %v2206_v34 = vld [vmem:[%s2479_s6] ss:$0 sm:$0xff] }
  0xca   : > { %1517 = vmatmul.msk.bf16.gmra.mxu1 %vm664_vm2, %v630_v38 }
  0xce   : > { %v533_v40 = vpop.f32.mrf.mxu0 }
  0xcf   : > { %v534_v41 = vadd.f32 %v2136_v14, %v533_v40  ;;  %v1681_v43 = vpop.eup %1680 }
  0xd1   : > { %1682 = vtanh.f32 %v534_v41 }
  0xd6   : > { %v536_v44 = vpop.f32.mrf.mxu0 }
  0xd7   : > { %v1683_v45 = vpop.eup %1682  ;;  %v537_v47 = vadd.f32 %v2136_v14, %v536_v44 }
  0xd8   : > { %v631_v46 = vpack.c.bf16 %v1683_v45, %v1681_v43 }
  0xd9   : > { %1503 = vmatmul.msk.bf16.gmra.mxu0 %vm454_vm1, %v1597_v42  ;;  %1684 = vtanh.f32 %v537_v47 }
  0xda   : > { %1518 = vmatmul.msk.bf16.gmra.mxu1 %vm664_vm2, %v631_v46 }
  0xde   : > { %v538_v48 = vpop.f32.mrf.mxu0 }
  0xdf   : > { %v539_v49 = vadd.f32 %v2136_v14, %v538_v48  ;;  %v1685_v51 = vpop.eup %1684 }
  0xe1   : > { %1686 = vtanh.f32 %v539_v49 }
  0xe6   : > { %v541_v52 = vpop.f32.mrf.mxu0 }
  0xe7   : > { %v1687_v53 = vpop.eup %1686  ;;  %v542_v55 = vadd.f32 %v2136_v14, %v541_v52 }
  0xe8   : > { %v632_v54 = vpack.c.bf16 %v1687_v53, %v1685_v51 }
  0xe9   : > { %1504 = vmatmul.msk.bf16.gmra.mxu0 %vm454_vm1, %v1598_v50  ;;  %1688 = vtanh.f32 %v542_v55 }
  0xea   : > { %1519 = vmatmul.msk.bf16.gmra.mxu1 %vm664_vm2, %v632_v54 }
  0xee   : > { %v543_v56 = vpop.f32.mrf.mxu0 }
  0xef   : > { %v544_v57 = vadd.f32 %v2136_v14, %v543_v56  ;;  %v1689_v59 = vpop.eup %1688 }
  0xf1   : > { %1690 = vtanh.f32 %v544_v57 }
  0xf6   : > { %v546_v60 = vpop.f32.mrf.mxu0 }
  0xf7   : > { %v1691_v61 = vpop.eup %1690  ;;  %v547_v63 = vadd.f32 %v2136_v14, %v546_v60 }
  0xf8   : > { %v633_v62 = vpack.c.bf16 %v1691_v61, %v1689_v59 }
  0xf9   : > { %1505 = vmatmul.msk.bf16.gmra.mxu0 %vm454_vm1, %v1599_v58  ;;  %1692 = vtanh.f32 %v547_v63 }
  0xfa   : > { %1520 = vmatmul.msk.bf16.gmra.mxu1 %vm664_vm2, %v633_v62 }
  0xfe   : > { %v548_v0 = vpop.f32.mrf.mxu0 }
  0xff   : > { %v549_v1 = vadd.f32 %v2136_v14, %v548_v0  ;;  %v1693_v3 = vpop.eup %1692 }
 0x101   : > { %1694 = vtanh.f32 %v549_v1 }
 0x106   : > { %v551_v4 = vpop.f32.mrf.mxu0 }
 0x107   : > { %v1695_v5 = vpop.eup %1694  ;;  %v552_v7 = vadd.f32 %v2136_v14, %v551_v4 }
 0x108   : > { %v634_v6 = vpack.c.bf16 %v1695_v5, %v1693_v3 }
 0x109   : > { %1506 = vmatmul.msk.bf16.gmra.mxu0 %vm454_vm1, %v1600_v2  ;;  %1696 = vtanh.f32 %v552_v7 }
 0x10a   : > { %1521 = vmatmul.msk.bf16.gmra.mxu1 %vm664_vm2, %v634_v6 }
 0x10e   : > { %v553_v8 = vpop.f32.mrf.mxu0 }
 0x10f   : > { %v554_v9 = vadd.f32 %v2136_v14, %v553_v8  ;;  %v1697_v20 = vpop.eup %1696 }
 0x111   : > { %1698 = vtanh.f32 %v554_v9 }
 0x116   : > { %v556_v21 = vpop.f32.mrf.mxu0 }
 0x117   : > { %v1699_v24 = vpop.eup %1698  ;;  %v557_v27 = vadd.f32 %v2136_v14, %v556_v21 }
 0x118   : > { %v635_v26 = vpack.c.bf16 %v1699_v24, %v1697_v20 }
 0x119   : > { %1700 = vtanh.f32 %v557_v27 }
 0x11a   : > { %1522 = vmatmul.msk.bf16.gmra.mxu1 %vm664_vm2, %v635_v26 }
 0x11e   : > { %v558_v28 = vpop.f32.mrf.mxu0 }
 0x11f   : > { %v559_v29 = vadd.f32 %v2136_v14, %v558_v28  ;;  %v1701_v30 = vpop.eup %1700 }
 0x121   : > { %1702 = vtanh.f32 %v559_v29 }
 0x126   : > { %v561_v31 = vpop.f32.mrf.mxu0 }
 0x127   : > { %v1703_v32 = vpop.eup %1702  ;;  %v722_v33 = vpop.f32.mrf.mxu1  ;;  %v562_v36 = vadd.f32 %v2136_v14, %v561_v31 }
 0x128   : > { %v636_v35 = vpack.c.bf16 %v1703_v32, %v1701_v30  ;;  %v723_v37 = vadd.f32 %v2206_v34, %v722_v33 }
 0x129   : > { %1704 = vtanh.f32 %v562_v36 }
 0x12a   : > { %1523 = vmatmul.msk.bf16.gmra.mxu1 %vm664_vm2, %v636_v35  ;;  %1706 = vtanh.f32 %v723_v37 }
 0x12e   : > { %v563_v38 = vpop.f32.mrf.mxu0 }
 0x12f   : > { %v564_v39 = vadd.f32 %v2136_v14, %v563_v38  ;;  %v724_v40 = vpop.f32.mrf.mxu1  ;;  %v1705_v42 = vpop.eup %1704 }
 0x130   : > { %v725_v41 = vadd.f32 %v2206_v34, %v724_v40  ;;  %v1707_v43 = vpop.eup %1706 }
 0x131   : > { %1708 = vtanh.f32 %v564_v39 }
 0x132   : > { %1710 = vtanh.f32 %v725_v41 }
 0x136   : > { %v566_v44 = vpop.f32.mrf.mxu0 }
 0x137   : > { %v1709_v45 = vpop.eup %1708  ;;  %v727_v46 = vpop.f32.mrf.mxu1  ;;  %v567_v50 = vadd.f32 %v2136_v14, %v566_v44 }
 0x138   : > { %v1711_v47 = vpop.eup %1710  ;;  %v637_v48 = vpack.c.bf16 %v1709_v45, %v1705_v42  ;;  %v728_v51 = vadd.f32 %v2206_v34, %v727_v46 }
 0x139   : > { %v834_v49 = vpack.c.bf16 %v1711_v47, %v1707_v43  ;;  %1712 = vtanh.f32 %v567_v50 }
 0x13a   : > { %1524 = vmatmul.msk.bf16.gmra.mxu1 %vm664_vm2, %v637_v48  ;;  %1714 = vtanh.f32 %v728_v51 }
 0x13b   : > { %1547 = vmatmul.msk.bf16.vlgmr.msra.gmra.mxu2 %vm664_vm2, %v834_v49  ;;  %1563 = vmatmul.msk.bf16.vlgmr.msra.gmra.mxu3 %vm664_vm2, %v834_v49 }
 0x13e   : > { %v568_v52 = vpop.f32.mrf.mxu0 }
 0x13f   : > { %v569_v53 = vadd.f32 %v2136_v14, %v568_v52  ;;  %v729_v54 = vpop.f32.mrf.mxu1  ;;  %v1713_v56 = vpop.eup %1712 }
 0x140   : > { %v730_v55 = vadd.f32 %v2206_v34, %v729_v54  ;;  %v1715_v57 = vpop.eup %1714 }
 0x141   : > { %1716 = vtanh.f32 %v569_v53 }
 0x142   : > { %1718 = vtanh.f32 %v730_v55 }
 0x146   : > { %v571_v58 = vpop.f32.mrf.mxu0 }
 0x147   : > { %v1717_v59 = vpop.eup %1716  ;;  %v732_v60 = vpop.f32.mrf.mxu1  ;;  %v572_v0 = vadd.f32 %v2136_v14, %v571_v58 }
 0x148   : > { %v1719_v61 = vpop.eup %1718  ;;  %v638_v62 = vpack.c.bf16 %v1717_v59, %v1713_v56  ;;  %v733_v1 = vadd.f32 %v2206_v34, %v732_v60 }
 0x149   : > { %v835_v63 = vpack.c.bf16 %v1719_v61, %v1715_v57  ;;  %1720 = vtanh.f32 %v572_v0 }
 0x14a   : > { %1525 = vmatmul.msk.bf16.gmra.mxu1 %vm664_vm2, %v638_v62  ;;  %1722 = vtanh.f32 %v733_v1 }
 0x14b   : > { %1548 = vmatmul.msk.bf16.gmra.mxu2 %vm664_vm2, %v835_v63  ;;  %1564 = vmatmul.msk.bf16.gmra.mxu3 %vm664_vm2, %v835_v63 }
 0x14e   : > { %v573_v2 = vpop.f32.mrf.mxu0 }
 0x14f   : > { %v574_v3 = vadd.f32 %v2136_v14, %v573_v2  ;;  %v734_v4 = vpop.f32.mrf.mxu1  ;;  %v1721_v6 = vpop.eup %1720 }
 0x150   : > { %v735_v5 = vadd.f32 %v2206_v34, %v734_v4  ;;  %v1723_v7 = vpop.eup %1722 }
 0x151   : > { %1724 = vtanh.f32 %v574_v3 }
 0x152   : > { %1726 = vtanh.f32 %v735_v5 }
 0x156   : > { %v576_v8 = vpop.f32.mrf.mxu0 }
 0x157   : > { %v1725_v9 = vpop.eup %1724  ;;  %v737_v10 = vpop.f32.mrf.mxu1  ;;  %v577_v15 = vadd.f32 %v2136_v14, %v576_v8 }
 0x158   : > { %v1727_v11 = vpop.eup %1726  ;;  %v639_v12 = vpack.c.bf16 %v1725_v9, %v1721_v6  ;;  %v738_v16 = vadd.f32 %v2206_v34, %v737_v10 }
 0x159   : > { %v836_v13 = vpack.c.bf16 %v1727_v11, %v1723_v7  ;;  %1728 = vtanh.f32 %v577_v15 }
 0x15a   : > { %1526 = vmatmul.msk.bf16.gmra.mxu1 %vm664_vm2, %v639_v12  ;;  %1730 = vtanh.f32 %v738_v16 }
 0x15b   : > { %1549 = vmatmul.msk.bf16.gmra.mxu2 %vm664_vm2, %v836_v13  ;;  %1565 = vmatmul.msk.bf16.gmra.mxu3 %vm664_vm2, %v836_v13 }
 0x15e   : > { %v578_v17 = vpop.f32.mrf.mxu0 }
 0x15f   : > { %v579_v18 = vadd.f32 %v2136_v14, %v578_v17  ;;  %v739_v19 = vpop.f32.mrf.mxu1  ;;  %v1729_v21 = vpop.eup %1728 }
 0x160   : > { %v740_v20 = vadd.f32 %v2206_v34, %v739_v19  ;;  %v1731_v22 = vpop.eup %1730 }
 0x161   : > { %1732 = vtanh.f32 %v579_v18 }
 0x162   : > { %1734 = vtanh.f32 %v740_v20  ;;  %v854_v20 = vld [vmem:[%s2475_s2] sm:$0x3] }
 0x166   : > { %v581_v23 = vpop.f32.mrf.mxu0 }
 0x167   : > { %v1733_v24 = vpop.eup %1732  ;;  %v742_v25 = vpop.f32.mrf.mxu1  ;;  %v582_v29 = vadd.f32 %v2136_v14, %v581_v23  ;;  %v2271_v23 = vperm.slane %v854_v20, 1 }
 0x168   : > { %v1735_v26 = vpop.eup %1734  ;;  %v640_v27 = vpack.c.bf16 %v1733_v24, %v1729_v21  ;;  %v743_v30 = vadd.f32 %v2206_v34, %v742_v25 }
 0x169   : > { %v837_v28 = vpack.c.bf16 %v1735_v26, %v1731_v22  ;;  %1736 = vtanh.f32 %v582_v29  ;;  %v2269_v22 = vperm.slane %v854_v20, 0 }
 0x16a   : > { %1527 = vmatmul.msk.bf16.gmra.mxu1 %vm664_vm2, %v640_v27  ;;  %1738 = vtanh.f32 %v743_v30 }
 0x16b   : > { %1550 = vmatmul.msk.bf16.gmra.mxu2 %vm664_vm2, %v837_v28  ;;  %1566 = vmatmul.msk.bf16.gmra.mxu3 %vm664_vm2, %v837_v28 }
 0x16e   : > { %v583_v31 = vpop.f32.mrf.mxu0 }
 0x16f   : > { %v584_v32 = vadd.f32 %v2136_v14, %v583_v31  ;;  %v744_v33 = vpop.f32.mrf.mxu1  ;;  %v1737_v36 = vpop.eup %1736 }
 0x170   : > { %v745_v35 = vadd.f32 %v2206_v34, %v744_v33  ;;  %v1739_v37 = vpop.eup %1738 }
 0x171   : > { %1740 = vtanh.f32 %v584_v32 }
 0x172   : > { %1742 = vtanh.f32 %v745_v35 }
 0x176   : > { %v586_v38 = vpop.f32.mrf.mxu0 }
 0x177   : > { %v1741_v39 = vpop.eup %1740  ;;  %v747_v40 = vpop.f32.mrf.mxu1  ;;  %v587_v44 = vadd.f32 %v2136_v14, %v586_v38 }
 0x178   : > { %v1743_v41 = vpop.eup %1742  ;;  %v641_v42 = vpack.c.bf16 %v1741_v39, %v1737_v36  ;;  %v748_v45 = vadd.f32 %v2206_v34, %v747_v40 }
 0x179   : > { %v838_v43 = vpack.c.bf16 %v1743_v41, %v1739_v37  ;;  %1744 = vtanh.f32 %v587_v44 }
 0x17a   : > { %1528 = vmatmul.msk.bf16.gmra.mxu1 %vm664_vm2, %v641_v42  ;;  %1746 = vtanh.f32 %v748_v45 }
 0x17b   : > { %1551 = vmatmul.msk.bf16.gmra.mxu2 %vm664_vm2, %v838_v43  ;;  %1567 = vmatmul.msk.bf16.gmra.mxu3 %vm664_vm2, %v838_v43 }
 0x17e   : > { %v588_v46 = vpop.f32.mrf.mxu0 }
 0x17f   : > { %v589_v47 = vadd.f32 %v2136_v14, %v588_v46  ;;  %v749_v48 = vpop.f32.mrf.mxu1  ;;  %v1745_v50 = vpop.eup %1744 }
 0x180   : > { %v750_v49 = vadd.f32 %v2206_v34, %v749_v48  ;;  %v1747_v51 = vpop.eup %1746 }
 0x181   : > { %1748 = vtanh.f32 %v589_v47 }
 0x182   : > { %1750 = vtanh.f32 %v750_v49 }
 0x186   : > { %v591_v52 = vpop.f32.mrf.mxu0 }
 0x187   : > { %v1749_v53 = vpop.eup %1748  ;;  %v752_v54 = vpop.f32.mrf.mxu1  ;;  %v592_v58 = vadd.f32 %v2136_v14, %v591_v52 }
 0x188   : > { %v1751_v55 = vpop.eup %1750  ;;  %v642_v56 = vpack.c.bf16 %v1749_v53, %v1745_v50  ;;  %v753_v59 = vadd.f32 %v2206_v34, %v752_v54 }
 0x189   : > { %v839_v57 = vpack.c.bf16 %v1751_v55, %v1747_v51  ;;  %1752 = vtanh.f32 %v592_v58 }
 0x18a   : > { %1529 = vmatmul.msk.bf16.gmra.mxu1 %vm664_vm2, %v642_v56  ;;  %1754 = vtanh.f32 %v753_v59 }
 0x18b   : > { %1552 = vmatmul.msk.bf16.gmra.mxu2 %vm664_vm2, %v839_v57  ;;  %1568 = vmatmul.msk.bf16.gmra.mxu3 %vm664_vm2, %v839_v57 }
 0x18e   : > { %v593_v60 = vpop.f32.mrf.mxu0 }
 0x18f   : > { %v594_v61 = vadd.f32 %v2136_v14, %v593_v60  ;;  %v754_v62 = vpop.f32.mrf.mxu1  ;;  %v1753_v0 = vpop.eup %1752 }
 0x190   : > { %v755_v63 = vadd.f32 %v2206_v34, %v754_v62  ;;  %v1755_v1 = vpop.eup %1754 }
 0x191   : > { %1756 = vtanh.f32 %v594_v61 }
 0x192   : > { %1758 = vtanh.f32 %v755_v63 }
 0x197   : > { %v1757_v2 = vpop.eup %1756  ;;  %v757_v3 = vpop.f32.mrf.mxu1 }
 0x198   : > { %v1759_v4 = vpop.eup %1758  ;;  %v643_v5 = vpack.c.bf16 %v1757_v2, %v1753_v0  ;;  %v758_v14 = vadd.f32 %v2206_v34, %v757_v3 }
 0x199   : > { %v840_v6 = vpack.c.bf16 %v1759_v4, %v1755_v1 }
 0x19a   : > { %1530 = vmatmul.msk.bf16.gmra.mxu1 %vm664_vm2, %v643_v5  ;;  %1760 = vtanh.f32 %v758_v14 }
 0x19b   : > { %1553 = vmatmul.msk.bf16.gmra.mxu2 %vm664_vm2, %v840_v6  ;;  %1569 = vmatmul.msk.bf16.gmra.mxu3 %vm664_vm2, %v840_v6 }
 0x19f   : > { %v759_v7 = vpop.f32.mrf.mxu1 }
 0x1a0   : > { %v760_v8 = vadd.f32 %v2206_v34, %v759_v7  ;;  %v1761_v9 = vpop.eup %1760 }
 0x1a2   : > { %1762 = vtanh.f32 %v760_v8 }
 0x1a7   : > { %v762_v10 = vpop.f32.mrf.mxu1 }
 0x1a8   : > { %v1763_v11 = vpop.eup %1762  ;;  %v763_v13 = vadd.f32 %v2206_v34, %v762_v10 }
 0x1a9   : > { %v841_v12 = vpack.c.bf16 %v1763_v11, %v1761_v9 }
 0x1aa   : > { %1764 = vtanh.f32 %v763_v13 }
 0x1ab   : > { %1554 = vmatmul.msk.bf16.gmra.mxu2 %vm664_vm2, %v841_v12  ;;  %1570 = vmatmul.msk.bf16.gmra.mxu3 %vm664_vm2, %v841_v12 }
 0x1af   : > { %v764_v15 = vpop.f32.mrf.mxu1 }
 0x1b0   : > { %v765_v16 = vadd.f32 %v2206_v34, %v764_v15  ;;  %v1765_v17 = vpop.eup %1764 }
 0x1b2   : > { %1766 = vtanh.f32 %v765_v16 }
 0x1b7   : > { %v767_v18 = vpop.f32.mrf.mxu1 }
 0x1b8   : > { %v1767_v19 = vpop.eup %1766  ;;  %v768_v24 = vadd.f32 %v2206_v34, %v767_v18 }
 0x1b9   : > { %v842_v21 = vpack.c.bf16 %v1767_v19, %v1765_v17 }
 0x1ba   : > { %1768 = vtanh.f32 %v768_v24 }
 0x1bb   : > { %1555 = vmatmul.msk.bf16.gmra.mxu2 %vm664_vm2, %v842_v21  ;;  %1571 = vmatmul.msk.bf16.gmra.mxu3 %vm664_vm2, %v842_v21 }
 0x1be   : > { %v937_v25 = vpop.f32.mrf.mxu2  ;;  %v1026_v26 = vpop.f32.mrf.mxu3 }
 0x1bf   : > { %v938_v27 = vadd.f32 %v937_v25, %v2269_v22  ;;  %v1027_v28 = vadd.f32 %v1026_v26, %v2271_v23  ;;  %v769_v29 = vpop.f32.mrf.mxu1 }
 0x1c0   : > { %v770_v30 = vadd.f32 %v2206_v34, %v769_v29  ;;  %v1769_v36 = vpop.eup %1768 }
 0x1c1   : > { %v1106_v31 = vmul.f32 1.442695, %v938_v27  ;;  %v1108_v32 = vmul.f32 1.442695, %v1027_v28 }
 0x1c2   : > { %1770 = vtanh.f32 %v770_v30 }
 0x1c3   : > { %1772 = vpow2.f32 %v1106_v31 }
 0x1c4   : > { %1774 = vpow2.f32 %v1108_v32 }
 0x1c6   : > { %v939_v33 = vpop.f32.mrf.mxu2  ;;  %v1028_v35 = vpop.f32.mrf.mxu3 }
 0x1c7   : > { %v940_v37 = vadd.f32 %v939_v33, %v2269_v22  ;;  %v1029_v38 = vadd.f32 %v1028_v35, %v2271_v23  ;;  %v772_v39 = vpop.f32.mrf.mxu1 }
 0x1c8   : > { %v1771_v40 = vpop.eup %1770  ;;  %v773_v46 = vadd.f32 %v2206_v34, %v772_v39 }
 0x1c9   : > { %v1773_v41 = vpop.eup %1772  ;;  %v1110_v42 = vmul.f32 1.442695, %v940_v37  ;;  %v1112_v43 = vmul.f32 1.442695, %v1029_v38  ;;  %v843_v44 = vpack.c.bf16 %v1771_v40, %v1769_v36 }
 0x1ca   : > { %v1775_v45 = vpop.eup %1774  ;;  %1234 = vst [vmem:[%s2282_s30] sm:$0xff] %v1773_v41 }
 0x1cb   : > { %1235 = vst [vmem:[%s2282_s30 + $0x8] sm:$0xff] %v1775_v45  ;;  %1776 = vpow2.f32 %v1110_v42  ;;  %1556 = vmatmul.msk.bf16.gmra.mxu2 %vm664_vm2, %v843_v44  ;;  %1572 = vmatmul.msk.bf16.gmra.mxu3 %vm664_vm2, %v843_v44 }
 0x1cc   : > { %1778 = vpow2.f32 %v1112_v43 }
 0x1cd   : > { %1780 = vtanh.f32 %v773_v46 }
 0x1ce   : > { %v942_v47 = vpop.f32.mrf.mxu2  ;;  %v1031_v48 = vpop.f32.mrf.mxu3 }
 0x1cf   : > { %v943_v49 = vadd.f32 %v942_v47, %v2269_v22  ;;  %v1032_v50 = vadd.f32 %v1031_v48, %v2271_v23  ;;  %v774_v51 = vpop.f32.mrf.mxu1 }
 0x1d0   : > { %v775_v52 = vadd.f32 %v2206_v34, %v774_v51 }
 0x1d1   : > { %v1777_v53 = vpop.eup %1776  ;;  %v1114_v54 = vmul.f32 1.442695, %v943_v49  ;;  %v1116_v55 = vmul.f32 1.442695, %v1032_v50 }
 0x1d2   : > { %v1779_v56 = vpop.eup %1778  ;;  %1236 = vst [vmem:[%s2282_s30 + $0x10] sm:$0xff] %v1777_v53  ;;  %1782 = vtanh.f32 %v775_v52 }
 0x1d3   : > { %1237 = vst [vmem:[%s2282_s30 + $0x18] sm:$0xff] %v1779_v56  ;;  %1784 = vpow2.f32 %v1114_v54  ;;  %v1781_v59 = vpop.eup %1780 }
 0x1d4   : > { %1786 = vpow2.f32 %v1116_v55 }
 0x1d6   : > { %v944_v57 = vpop.f32.mrf.mxu2  ;;  %v1033_v58 = vpop.f32.mrf.mxu3 }
 0x1d7   : > { %v945_v60 = vadd.f32 %v944_v57, %v2269_v22  ;;  %v1034_v61 = vadd.f32 %v1033_v58, %v2271_v23  ;;  %v777_v62 = vpop.f32.mrf.mxu1 }
 0x1d8   : > { %v1783_v63 = vpop.eup %1782  ;;  %v778_v5 = vadd.f32 %v2206_v34, %v777_v62 }
 0x1d9   : > { %v1785_v0 = vpop.eup %1784  ;;  %v1118_v1 = vmul.f32 1.442695, %v945_v60  ;;  %v1120_v2 = vmul.f32 1.442695, %v1034_v61  ;;  %v844_v3 = vpack.c.bf16 %v1783_v63, %v1781_v59 }
 0x1da   : > { %v1787_v4 = vpop.eup %1786  ;;  %1238 = vst [vmem:[%s2282_s30 + $0x20] sm:$0xff] %v1785_v0 }
 0x1db   : > { %1239 = vst [vmem:[%s2282_s30 + $0x28] sm:$0xff] %v1787_v4  ;;  %1788 = vpow2.f32 %v1118_v1  ;;  %1557 = vmatmul.msk.bf16.gmra.mxu2 %vm664_vm2, %v844_v3  ;;  %1573 = vmatmul.msk.bf16.gmra.mxu3 %vm664_vm2, %v844_v3 }
 0x1dc   : > { %1790 = vpow2.f32 %v1120_v2 }
 0x1dd   : > { %1792 = vtanh.f32 %v778_v5 }
 0x1de   : > { %v947_v6 = vpop.f32.mrf.mxu2  ;;  %v1036_v14 = vpop.f32.mrf.mxu3 }
 0x1df   : > { %v948_v7 = vadd.f32 %v947_v6, %v2269_v22  ;;  %v1037_v8 = vadd.f32 %v1036_v14, %v2271_v23  ;;  %v779_v9 = vpop.f32.mrf.mxu1 }
 0x1e0   : > { %v780_v10 = vadd.f32 %v2206_v34, %v779_v9 }
 0x1e1   : > { %v1789_v11 = vpop.eup %1788  ;;  %v1122_v12 = vmul.f32 1.442695, %v948_v7  ;;  %v1124_v13 = vmul.f32 1.442695, %v1037_v8 }
 0x1e2   : > { %v1791_v15 = vpop.eup %1790  ;;  %1240 = vst [vmem:[%s2282_s30 + $0x30] sm:$0xff] %v1789_v11  ;;  %1794 = vtanh.f32 %v780_v10 }
 0x1e3   : > { %1241 = vst [vmem:[%s2282_s30 + $0x38] sm:$0xff] %v1791_v15  ;;  %1796 = vpow2.f32 %v1122_v12  ;;  %v1793_v18 = vpop.eup %1792 }
 0x1e4   : > { %1798 = vpow2.f32 %v1124_v13 }
 0x1e6   : > { %v949_v16 = vpop.f32.mrf.mxu2  ;;  %v1038_v17 = vpop.f32.mrf.mxu3 }
 0x1e7   : > { %v950_v19 = vadd.f32 %v949_v16, %v2269_v22  ;;  %v1039_v20 = vadd.f32 %v1038_v17, %v2271_v23  ;;  %v782_v21 = vpop.f32.mrf.mxu1 }
 0x1e8   : > { %v1795_v24 = vpop.eup %1794  ;;  %v783_v30 = vadd.f32 %v2206_v34, %v782_v21 }
 0x1e9   : > { %v1797_v25 = vpop.eup %1796  ;;  %v1126_v26 = vmul.f32 1.442695, %v950_v19  ;;  %v1128_v27 = vmul.f32 1.442695, %v1039_v20  ;;  %v845_v28 = vpack.c.bf16 %v1795_v24, %v1793_v18 }
 0x1ea   : > { %v1799_v29 = vpop.eup %1798  ;;  %1242 = vst [vmem:[%s2282_s30 + $0x40] sm:$0xff] %v1797_v25 }
 0x1eb   : > { %1243 = vst [vmem:[%s2282_s30 + $0x48] sm:$0xff] %v1799_v29  ;;  %1800 = vpow2.f32 %v1126_v26  ;;  %1558 = vmatmul.msk.bf16.gmra.mxu2 %vm664_vm2, %v845_v28  ;;  %1574 = vmatmul.msk.bf16.gmra.mxu3 %vm664_vm2, %v845_v28 }
 0x1ec   : > { %1802 = vpow2.f32 %v1128_v27 }
 0x1ed   : > { %1804 = vtanh.f32 %v783_v30 }
 0x1ee   : > { %v952_v31 = vpop.f32.mrf.mxu2  ;;  %v1041_v32 = vpop.f32.mrf.mxu3 }
 0x1ef   : > { %v953_v33 = vadd.f32 %v952_v31, %v2269_v22  ;;  %v1042_v35 = vadd.f32 %v1041_v32, %v2271_v23  ;;  %v784_v36 = vpop.f32.mrf.mxu1 }
 0x1f0   : > { %v785_v37 = vadd.f32 %v2206_v34, %v784_v36 }
 0x1f1   : > { %v1801_v38 = vpop.eup %1800  ;;  %v1130_v39 = vmul.f32 1.442695, %v953_v33  ;;  %v1132_v40 = vmul.f32 1.442695, %v1042_v35 }
 0x1f2   : > { %v1803_v41 = vpop.eup %1802  ;;  %1244 = vst [vmem:[%s2282_s30 + $0x50] sm:$0xff] %v1801_v38  ;;  %1806 = vtanh.f32 %v785_v37 }
 0x1f3   : > { %1245 = vst [vmem:[%s2282_s30 + $0x58] sm:$0xff] %v1803_v41  ;;  %1808 = vpow2.f32 %v1130_v39  ;;  %v1805_v44 = vpop.eup %1804 }
 0x1f4   : > { %1810 = vpow2.f32 %v1132_v40 }
 0x1f6   : > { %v954_v42 = vpop.f32.mrf.mxu2  ;;  %v1043_v43 = vpop.f32.mrf.mxu3 }
 0x1f7   : > { %v955_v45 = vadd.f32 %v954_v42, %v2269_v22  ;;  %v1044_v46 = vadd.f32 %v1043_v43, %v2271_v23  ;;  %v787_v47 = vpop.f32.mrf.mxu1 }
 0x1f8   : > { %v1807_v48 = vpop.eup %1806  ;;  %v788_v54 = vadd.f32 %v2206_v34, %v787_v47 }
 0x1f9   : > { %v1809_v49 = vpop.eup %1808  ;;  %v1134_v50 = vmul.f32 1.442695, %v955_v45  ;;  %v1136_v51 = vmul.f32 1.442695, %v1044_v46  ;;  %v846_v52 = vpack.c.bf16 %v1807_v48, %v1805_v44 }
 0x1fa   : > { %v1811_v53 = vpop.eup %1810  ;;  %1246 = vst [vmem:[%s2282_s30 + $0x60] sm:$0xff] %v1809_v49 }
 0x1fb   : > { %1247 = vst [vmem:[%s2282_s30 + $0x68] sm:$0xff] %v1811_v53  ;;  %1812 = vpow2.f32 %v1134_v50  ;;  %1559 = vmatmul.msk.bf16.gmra.mxu2 %vm664_vm2, %v846_v52  ;;  %1575 = vmatmul.msk.bf16.gmra.mxu3 %vm664_vm2, %v846_v52 }
 0x1fc   : > { %1814 = vpow2.f32 %v1136_v51 }
 0x1fd   : > { %1816 = vtanh.f32 %v788_v54 }
 0x1fe   : > { %v957_v55 = vpop.f32.mrf.mxu2  ;;  %v1046_v56 = vpop.f32.mrf.mxu3 }
 0x1ff   : > { %v958_v57 = vadd.f32 %v957_v55, %v2269_v22  ;;  %v1047_v58 = vadd.f32 %v1046_v56, %v2271_v23  ;;  %v789_v59 = vpop.f32.mrf.mxu1 }
 0x200   : > { %v790_v60 = vadd.f32 %v2206_v34, %v789_v59 }
 0x201   : > { %v1813_v61 = vpop.eup %1812  ;;  %v1138_v62 = vmul.f32 1.442695, %v958_v57  ;;  %v1140_v63 = vmul.f32 1.442695, %v1047_v58 }
 0x202   : > { %v1815_v0 = vpop.eup %1814  ;;  %1248 = vst [vmem:[%s2282_s30 + $0x70] sm:$0xff] %v1813_v61  ;;  %1818 = vtanh.f32 %v790_v60 }
 0x203   : > { %1249 = vst [vmem:[%s2282_s30 + $0x78] sm:$0xff] %v1815_v0  ;;  %1820 = vpow2.f32 %v1138_v62  ;;  %v1817_v3 = vpop.eup %1816 }
 0x204   : > { %1822 = vpow2.f32 %v1140_v63 }
 0x206   : > { %v959_v1 = vpop.f32.mrf.mxu2  ;;  %v1048_v2 = vpop.f32.mrf.mxu3 }
 0x207   : > { %v960_v4 = vadd.f32 %v959_v1, %v2269_v22  ;;  %v1049_v5 = vadd.f32 %v1048_v2, %v2271_v23  ;;  %v792_v6 = vpop.f32.mrf.mxu1 }
 0x208   : > { %v1819_v14 = vpop.eup %1818  ;;  %v793_v12 = vadd.f32 %v2206_v34, %v792_v6 }
 0x209   : > { %v1821_v7 = vpop.eup %1820  ;;  %v1142_v8 = vmul.f32 1.442695, %v960_v4  ;;  %v1144_v9 = vmul.f32 1.442695, %v1049_v5  ;;  %v847_v10 = vpack.c.bf16 %v1819_v14, %v1817_v3 }
 0x20a   : > { %v1823_v11 = vpop.eup %1822  ;;  %1250 = vst [vmem:[%s2282_s30 + $0x80] sm:$0xff] %v1821_v7 }
 0x20b   : > { %1251 = vst [vmem:[%s2282_s30 + $0x88] sm:$0xff] %v1823_v11  ;;  %1824 = vpow2.f32 %v1142_v8  ;;  %1560 = vmatmul.msk.bf16.gmra.mxu2 %vm664_vm2, %v847_v10  ;;  %1576 = vmatmul.msk.bf16.gmra.mxu3 %vm664_vm2, %v847_v10 }
 0x20c   : > { %1826 = vpow2.f32 %v1144_v9 }
 0x20d   : > { %1828 = vtanh.f32 %v793_v12 }
 0x20e   : > { %v962_v13 = vpop.f32.mrf.mxu2  ;;  %v1051_v15 = vpop.f32.mrf.mxu3 }
 0x20f   : > { %v963_v16 = vadd.f32 %v962_v13, %v2269_v22  ;;  %v1052_v17 = vadd.f32 %v1051_v15, %v2271_v23  ;;  %v794_v18 = vpop.f32.mrf.mxu1 }
 0x210   : > { %v795_v19 = vadd.f32 %v2206_v34, %v794_v18 }
 0x211   : > { %v1825_v20 = vpop.eup %1824  ;;  %v1146_v21 = vmul.f32 1.442695, %v963_v16  ;;  %v1148_v24 = vmul.f32 1.442695, %v1052_v17 }
 0x212   : > { %v1827_v25 = vpop.eup %1826  ;;  %1252 = vst [vmem:[%s2282_s30 + $0x90] sm:$0xff] %v1825_v20  ;;  %1830 = vtanh.f32 %v795_v19 }
 0x213   : > { %1253 = vst [vmem:[%s2282_s30 + $0x98] sm:$0xff] %v1827_v25  ;;  %1832 = vpow2.f32 %v1146_v21  ;;  %v1829_v28 = vpop.eup %1828 }
 0x214   : > { %1834 = vpow2.f32 %v1148_v24 }
 0x216   : > { %v964_v26 = vpop.f32.mrf.mxu2  ;;  %v1053_v27 = vpop.f32.mrf.mxu3 }
 0x217   : > { %v965_v29 = vadd.f32 %v964_v26, %v2269_v22  ;;  %v1054_v30 = vadd.f32 %v1053_v27, %v2271_v23  ;;  %v797_v31 = vpop.f32.mrf.mxu1 }
 0x218   : > { %v1831_v32 = vpop.eup %1830  ;;  %v798_v39 = vadd.f32 %v2206_v34, %v797_v31 }
 0x219   : > { %v1833_v33 = vpop.eup %1832  ;;  %v1150_v35 = vmul.f32 1.442695, %v965_v29  ;;  %v1152_v36 = vmul.f32 1.442695, %v1054_v30  ;;  %v848_v37 = vpack.c.bf16 %v1831_v32, %v1829_v28 }
 0x21a   : > { %v1835_v38 = vpop.eup %1834  ;;  %1254 = vst [vmem:[%s2282_s30 + $0xa0] sm:$0xff] %v1833_v33 }
 0x21b   : > { %1255 = vst [vmem:[%s2282_s30 + $0xa8] sm:$0xff] %v1835_v38  ;;  %1836 = vpow2.f32 %v1150_v35  ;;  %1561 = vmatmul.msk.bf16.gmra.mxu2 %vm664_vm2, %v848_v37  ;;  %1577 = vmatmul.msk.bf16.gmra.mxu3 %vm664_vm2, %v848_v37 }
 0x21c   : > { %1838 = vpow2.f32 %v1152_v36 }
 0x21d   : > { %1840 = vtanh.f32 %v798_v39 }
 0x21e   : > { %v967_v40 = vpop.f32.mrf.mxu2  ;;  %v1056_v41 = vpop.f32.mrf.mxu3 }
 0x21f   : > { %v968_v42 = vadd.f32 %v967_v40, %v2269_v22  ;;  %v1057_v43 = vadd.f32 %v1056_v41, %v2271_v23  ;;  %v799_v44 = vpop.f32.mrf.mxu1 }
 0x220   : > { %v800_v45 = vadd.f32 %v2206_v34, %v799_v44 }
 0x221   : > { %v1837_v46 = vpop.eup %1836  ;;  %v1154_v47 = vmul.f32 1.442695, %v968_v42  ;;  %v1156_v48 = vmul.f32 1.442695, %v1057_v43 }
 0x222   : > { %v1839_v49 = vpop.eup %1838  ;;  %1256 = vst [vmem:[%s2282_s30 + $0xb0] sm:$0xff] %v1837_v46  ;;  %1842 = vtanh.f32 %v800_v45 }
 0x223   : > { %1257 = vst [vmem:[%s2282_s30 + $0xb8] sm:$0xff] %v1839_v49  ;;  %1844 = vpow2.f32 %v1154_v47  ;;  %v1841_v52 = vpop.eup %1840 }
 0x224   : > { %1846 = vpow2.f32 %v1156_v48 }
 0x226   : > { %v969_v50 = vpop.f32.mrf.mxu2  ;;  %v1058_v51 = vpop.f32.mrf.mxu3 }
 0x227   : > { %v970_v53 = vadd.f32 %v969_v50, %v2269_v22  ;;  %v1059_v54 = vadd.f32 %v1058_v51, %v2271_v23 }
 0x228   : > { %v1843_v34 = vpop.eup %1842 }
 0x229   : > { %v1845_v55 = vpop.eup %1844  ;;  %v1158_v56 = vmul.f32 1.442695, %v970_v53  ;;  %v1160_v57 = vmul.f32 1.442695, %v1059_v54  ;;  %v849_v58 = vpack.c.bf16 %v1843_v34, %v1841_v52 }
 0x22a   : > { %v1847_v59 = vpop.eup %1846  ;;  %1258 = vst [vmem:[%s2282_s30 + $0xc0] sm:$0xff] %v1845_v55 }
 0x22b   : > { %1259 = vst [vmem:[%s2282_s30 + $0xc8] sm:$0xff] %v1847_v59  ;;  %1848 = vpow2.f32 %v1158_v56  ;;  %1562 = vmatmul.msk.bf16.gmra.mxu2 %vm664_vm2, %v849_v58  ;;  %1578 = vmatmul.msk.bf16.gmra.mxu3 %vm664_vm2, %v849_v58 }
 0x22c   : > { %1850 = vpow2.f32 %v1160_v57 }
 0x22e   : > { %v972_v60 = vpop.f32.mrf.mxu2  ;;  %v1061_v61 = vpop.f32.mrf.mxu3 }
 0x22f   : > { %v973_v62 = vadd.f32 %v972_v60, %v2269_v22  ;;  %v1062_v63 = vadd.f32 %v1061_v61, %v2271_v23 }
 0x231   : > { %v1849_v0 = vpop.eup %1848  ;;  %v1162_v1 = vmul.f32 1.442695, %v973_v62  ;;  %v1164_v2 = vmul.f32 1.442695, %v1062_v63 }
 0x232   : > { %v1851_v3 = vpop.eup %1850  ;;  %1260 = vst [vmem:[%s2282_s30 + $0xd0] sm:$0xff] %v1849_v0 }
 0x233   : > { %1261 = vst [vmem:[%s2282_s30 + $0xd8] sm:$0xff] %v1851_v3  ;;  %1852 = vpow2.f32 %v1162_v1 }
 0x234   : > { %1854 = vpow2.f32 %v1164_v2 }
 0x236   : > { %v974_v4 = vpop.f32.mrf.mxu2  ;;  %v1063_v5 = vpop.f32.mrf.mxu3 }
 0x237   : > { %v975_v6 = vadd.f32 %v974_v4, %v2269_v22  ;;  %v1064_v14 = vadd.f32 %v1063_v5, %v2271_v23 }
 0x239   : > { %v1853_v7 = vpop.eup %1852  ;;  %v1166_v8 = vmul.f32 1.442695, %v975_v6  ;;  %v1168_v9 = vmul.f32 1.442695, %v1064_v14 }
 0x23a   : > { %v1855_v10 = vpop.eup %1854  ;;  %1262 = vst [vmem:[%s2282_s30 + $0xe0] sm:$0xff] %v1853_v7 }
 0x23b   : > { %1263 = vst [vmem:[%s2282_s30 + $0xe8] sm:$0xff] %v1855_v10  ;;  %1856 = vpow2.f32 %v1166_v8 }
 0x23c   : > { %1858 = vpow2.f32 %v1168_v9 }
 0x23e   : > { %v977_v11 = vpop.f32.mrf.mxu2  ;;  %v1066_v12 = vpop.f32.mrf.mxu3 }
 0x23f   : > { %v978_v13 = vadd.f32 %v977_v11, %v2269_v22  ;;  %v1067_v15 = vadd.f32 %v1066_v12, %v2271_v23 }
 0x241   : > { %v1857_v16 = vpop.eup %1856  ;;  %v1170_v17 = vmul.f32 1.442695, %v978_v13  ;;  %v1172_v18 = vmul.f32 1.442695, %v1067_v15 }
 0x242   : > { %v1859_v19 = vpop.eup %1858  ;;  %1264 = vst [vmem:[%s2282_s30 + $0xf0] sm:$0xff] %v1857_v16 }
 0x243   : > { %1265 = vst [vmem:[%s2282_s30 + $0xf8] sm:$0xff] %v1859_v19  ;;  %1860 = vpow2.f32 %v1170_v17 }
 0x244   : > { %1862 = vpow2.f32 %v1172_v18 }
 0x246   : > { %v979_v20 = vpop.f32.mrf.mxu2  ;;  %v1068_v21 = vpop.f32.mrf.mxu3 }
 0x247   : > { %v980_v24 = vadd.f32 %v979_v20, %v2269_v22  ;;  %v1069_v25 = vadd.f32 %v1068_v21, %v2271_v23 }
 0x249   : > { %v1861_v26 = vpop.eup %1860  ;;  %v1174_v27 = vmul.f32 1.442695, %v980_v24  ;;  %v1176_v28 = vmul.f32 1.442695, %v1069_v25 }
 0x24a   : > { %v1863_v29 = vpop.eup %1862  ;;  %1266 = vst [vmem:[%s2282_s30 + $0x100] sm:$0xff] %v1861_v26 }
 0x24b   : > { %1267 = vst [vmem:[%s2282_s30 + $0x108] sm:$0xff] %v1863_v29  ;;  %1864 = vpow2.f32 %v1174_v27 }
 0x24c   : > { %1866 = vpow2.f32 %v1176_v28 }
 0x24e   : > { %v982_v30 = vpop.f32.mrf.mxu2  ;;  %v1071_v31 = vpop.f32.mrf.mxu3 }
 0x24f   : > { %v983_v32 = vadd.f32 %v982_v30, %v2269_v22  ;;  %v1072_v33 = vadd.f32 %v1071_v31, %v2271_v23 }
 0x251   : > { %v1865_v35 = vpop.eup %1864  ;;  %v1178_v36 = vmul.f32 1.442695, %v983_v32  ;;  %v1180_v37 = vmul.f32 1.442695, %v1072_v33 }
 0x252   : > { %v1867_v38 = vpop.eup %1866  ;;  %1268 = vst [vmem:[%s2282_s30 + $0x110] sm:$0xff] %v1865_v35 }
 0x253   : > { %1269 = vst [vmem:[%s2282_s30 + $0x118] sm:$0xff] %v1867_v38  ;;  %1868 = vpow2.f32 %v1178_v36 }
 0x254   : > { %1870 = vpow2.f32 %v1180_v37 }
 0x256   : > { %v984_v39 = vpop.f32.mrf.mxu2  ;;  %v1073_v40 = vpop.f32.mrf.mxu3 }
 0x257   : > { %v985_v41 = vadd.f32 %v984_v39, %v2269_v22  ;;  %v1074_v42 = vadd.f32 %v1073_v40, %v2271_v23 }
 0x259   : > { %v1869_v43 = vpop.eup %1868  ;;  %v1182_v44 = vmul.f32 1.442695, %v985_v41  ;;  %v1184_v45 = vmul.f32 1.442695, %v1074_v42 }
 0x25a   : > { %v1871_v46 = vpop.eup %1870  ;;  %1270 = vst [vmem:[%s2282_s30 + $0x120] sm:$0xff] %v1869_v43 }
 0x25b   : > { %1271 = vst [vmem:[%s2282_s30 + $0x128] sm:$0xff] %v1871_v46  ;;  %1872 = vpow2.f32 %v1182_v44 }
 0x25c   : > { %1874 = vpow2.f32 %v1184_v45 }
 0x25e   : > { %v987_v47 = vpop.f32.mrf.mxu2  ;;  %v1076_v48 = vpop.f32.mrf.mxu3 }
 0x25f   : > { %v988_v49 = vadd.f32 %v987_v47, %v2269_v22  ;;  %v1077_v50 = vadd.f32 %v1076_v48, %v2271_v23 }
 0x261   : > { %v1873_v51 = vpop.eup %1872  ;;  %v1186_v52 = vmul.f32 1.442695, %v988_v49  ;;  %v1188_v53 = vmul.f32 1.442695, %v1077_v50 }
 0x262   : > { %v1875_v54 = vpop.eup %1874  ;;  %1272 = vst [vmem:[%s2282_s30 + $0x130] sm:$0xff] %v1873_v51 }
 0x263   : > { %1273 = vst [vmem:[%s2282_s30 + $0x138] sm:$0xff] %v1875_v54  ;;  %1876 = vpow2.f32 %v1186_v52 }
 0x264   : > { %1878 = vpow2.f32 %v1188_v53 }
 0x266   : > { %v989_v34 = vpop.f32.mrf.mxu2  ;;  %v1078_v55 = vpop.f32.mrf.mxu3 }
 0x267   : > { %v990_v56 = vadd.f32 %v989_v34, %v2269_v22  ;;  %v1079_v57 = vadd.f32 %v1078_v55, %v2271_v23 }
 0x269   : > { %v1877_v58 = vpop.eup %1876  ;;  %v1190_v59 = vmul.f32 1.442695, %v990_v56  ;;  %v1192_v60 = vmul.f32 1.442695, %v1079_v57 }
 0x26a   : > { %v1879_v61 = vpop.eup %1878  ;;  %1274 = vst [vmem:[%s2282_s30 + $0x140] sm:$0xff] %v1877_v58 }
 0x26b   : > { %1275 = vst [vmem:[%s2282_s30 + $0x148] sm:$0xff] %v1879_v61  ;;  %1880 = vpow2.f32 %v1190_v59 }
 0x26c   : > { %1882 = vpow2.f32 %v1192_v60 }
 0x26e   : > { %v992_v62 = vpop.f32.mrf.mxu2  ;;  %v1081_v63 = vpop.f32.mrf.mxu3 }
 0x26f   : > { %v993_v0 = vadd.f32 %v992_v62, %v2269_v22  ;;  %v1082_v1 = vadd.f32 %v1081_v63, %v2271_v23 }
 0x271   : > { %v1881_v2 = vpop.eup %1880  ;;  %v1194_v3 = vmul.f32 1.442695, %v993_v0  ;;  %v1196_v4 = vmul.f32 1.442695, %v1082_v1 }
 0x272   : > { %v1883_v5 = vpop.eup %1882  ;;  %1276 = vst [vmem:[%s2282_s30 + $0x150] sm:$0xff] %v1881_v2 }
 0x273   : > { %1277 = vst [vmem:[%s2282_s30 + $0x158] sm:$0xff] %v1883_v5  ;;  %1884 = vpow2.f32 %v1194_v3 }
 0x274   : > { %1886 = vpow2.f32 %v1196_v4 }
 0x276   : > { %v994_v6 = vpop.f32.mrf.mxu2  ;;  %v1083_v14 = vpop.f32.mrf.mxu3 }
 0x277   : > { %v995_v7 = vadd.f32 %v994_v6, %v2269_v22  ;;  %v1084_v8 = vadd.f32 %v1083_v14, %v2271_v23 }
 0x279   : > { %v1885_v9 = vpop.eup %1884  ;;  %v1198_v10 = vmul.f32 1.442695, %v995_v7  ;;  %v1200_v11 = vmul.f32 1.442695, %v1084_v8 }
 0x27a   : > { %v1887_v12 = vpop.eup %1886  ;;  %1278 = vst [vmem:[%s2282_s30 + $0x160] sm:$0xff] %v1885_v9 }
 0x27b   : > { %1279 = vst [vmem:[%s2282_s30 + $0x168] sm:$0xff] %v1887_v12  ;;  %1888 = vpow2.f32 %v1198_v10 }
 0x27c   : > { %1890 = vpow2.f32 %v1200_v11 }
 0x27e   : > { %v997_v13 = vpop.f32.mrf.mxu2  ;;  %v1086_v15 = vpop.f32.mrf.mxu3 }
 0x27f   : > { %v998_v16 = vadd.f32 %v997_v13, %v2269_v22  ;;  %v1087_v17 = vadd.f32 %v1086_v15, %v2271_v23 }
 0x281   : > { %v1889_v18 = vpop.eup %1888  ;;  %v1202_v19 = vmul.f32 1.442695, %v998_v16  ;;  %v1204_v20 = vmul.f32 1.442695, %v1087_v17 }
 0x282   : > { %v1891_v21 = vpop.eup %1890  ;;  %1280 = vst [vmem:[%s2282_s30 + $0x170] sm:$0xff] %v1889_v18 }
 0x283   : > { %1281 = vst [vmem:[%s2282_s30 + $0x178] sm:$0xff] %v1891_v21  ;;  %1892 = vpow2.f32 %v1202_v19 }
 0x284   : > { %1894 = vpow2.f32 %v1204_v20 }
 0x286   : > { %v999_v24 = vpop.f32.mrf.mxu2  ;;  %v1088_v25 = vpop.f32.mrf.mxu3 }
 0x287   : > { %v1000_v26 = vadd.f32 %v999_v24, %v2269_v22  ;;  %v1089_v27 = vadd.f32 %v1088_v25, %v2271_v23 }
 0x289   : > { %v1893_v28 = vpop.eup %1892  ;;  %v1206_v29 = vmul.f32 1.442695, %v1000_v26  ;;  %v1208_v30 = vmul.f32 1.442695, %v1089_v27 }
 0x28a   : > { %v1895_v31 = vpop.eup %1894  ;;  %1282 = vst [vmem:[%s2282_s30 + $0x180] sm:$0xff] %v1893_v28 }
 0x28b   : > { %1283 = vst [vmem:[%s2282_s30 + $0x188] sm:$0xff] %v1895_v31  ;;  %1896 = vpow2.f32 %v1206_v29 }
 0x28c   : > { %1898 = vpow2.f32 %v1208_v30 }
 0x28e   : > { %v1002_v32 = vpop.f32.mrf.mxu2  ;;  %v1091_v33 = vpop.f32.mrf.mxu3 }
 0x28f   : > { %v1003_v35 = vadd.f32 %v1002_v32, %v2269_v22  ;;  %v1092_v36 = vadd.f32 %v1091_v33, %v2271_v23 }
 0x291   : > { %v1897_v37 = vpop.eup %1896  ;;  %v1210_v38 = vmul.f32 1.442695, %v1003_v35  ;;  %v1212_v39 = vmul.f32 1.442695, %v1092_v36 }
 0x292   : > { %v1899_v40 = vpop.eup %1898  ;;  %1284 = vst [vmem:[%s2282_s30 + $0x190] sm:$0xff] %v1897_v37 }
 0x293   : > { %1285 = vst [vmem:[%s2282_s30 + $0x198] sm:$0xff] %v1899_v40  ;;  %1900 = vpow2.f32 %v1210_v38 }
 0x294   : > { %1902 = vpow2.f32 %v1212_v39 }
 0x296   : > { %v1004_v41 = vpop.f32.mrf.mxu2  ;;  %v1093_v42 = vpop.f32.mrf.mxu3 }
 0x297   : > { %v1005_v43 = vadd.f32 %v1004_v41, %v2269_v22  ;;  %v1094_v44 = vadd.f32 %v1093_v42, %v2271_v23 }
 0x299   : > { %v1901_v45 = vpop.eup %1900  ;;  %v1214_v46 = vmul.f32 1.442695, %v1005_v43  ;;  %v1216_v47 = vmul.f32 1.442695, %v1094_v44 }
 0x29a   : > { %v1903_v48 = vpop.eup %1902  ;;  %1286 = vst [vmem:[%s2282_s30 + $0x1a0] sm:$0xff] %v1901_v45 }
 0x29b   : > { %1287 = vst [vmem:[%s2282_s30 + $0x1a8] sm:$0xff] %v1903_v48  ;;  %1904 = vpow2.f32 %v1214_v46 }
 0x29c   : > { %1906 = vpow2.f32 %v1216_v47 }
 0x29e   : > { %v1007_v49 = vpop.f32.mrf.mxu2  ;;  %v1096_v50 = vpop.f32.mrf.mxu3 }
 0x29f   : > { %v1008_v51 = vadd.f32 %v1007_v49, %v2269_v22  ;;  %v1097_v52 = vadd.f32 %v1096_v50, %v2271_v23 }
 0x2a1   : > { %v1905_v53 = vpop.eup %1904  ;;  %v1218_v54 = vmul.f32 1.442695, %v1008_v51  ;;  %v1220_v34 = vmul.f32 1.442695, %v1097_v52 }
 0x2a2   : > { %v1907_v55 = vpop.eup %1906  ;;  %1288 = vst [vmem:[%s2282_s30 + $0x1b0] sm:$0xff] %v1905_v53 }
 0x2a3   : > { %1289 = vst [vmem:[%s2282_s30 + $0x1b8] sm:$0xff] %v1907_v55  ;;  %1908 = vpow2.f32 %v1218_v54 }
 0x2a4   : > { %1910 = vpow2.f32 %v1220_v34 }
 0x2a6   : > { %v1009_v56 = vpop.f32.mrf.mxu2  ;;  %v1098_v57 = vpop.f32.mrf.mxu3 }
 0x2a7   : > { %v1010_v58 = vadd.f32 %v1009_v56, %v2269_v22  ;;  %v1099_v59 = vadd.f32 %v1098_v57, %v2271_v23 }
 0x2a9   : > { %v1909_v60 = vpop.eup %1908  ;;  %v1222_v61 = vmul.f32 1.442695, %v1010_v58  ;;  %v1224_v62 = vmul.f32 1.442695, %v1099_v59 }
 0x2aa   : > { %v1911_v63 = vpop.eup %1910  ;;  %1290 = vst [vmem:[%s2282_s30 + $0x1c0] sm:$0xff] %v1909_v60 }
 0x2ab   : > { %1291 = vst [vmem:[%s2282_s30 + $0x1c8] sm:$0xff] %v1911_v63  ;;  %1912 = vpow2.f32 %v1222_v61 }
 0x2ac   : > { %1914 = vpow2.f32 %v1224_v62 }
 0x2ae   : > { %v1012_v0 = vpop.f32.mrf.mxu2  ;;  %v1101_v1 = vpop.f32.mrf.mxu3 }
 0x2af   : > { %v1013_v2 = vadd.f32 %v1012_v0, %v2269_v22  ;;  %v1102_v3 = vadd.f32 %v1101_v1, %v2271_v23 }
 0x2b1   : > { %v1913_v4 = vpop.eup %1912  ;;  %v1226_v5 = vmul.f32 1.442695, %v1013_v2  ;;  %v1228_v6 = vmul.f32 1.442695, %v1102_v3 }
 0x2b2   : > { %v1915_v14 = vpop.eup %1914  ;;  %1292 = vst [vmem:[%s2282_s30 + $0x1d0] sm:$0xff] %v1913_v4 }
 0x2b3   : > { %1293 = vst [vmem:[%s2282_s30 + $0x1d8] sm:$0xff] %v1915_v14  ;;  %1916 = vpow2.f32 %v1226_v5 }
 0x2b4   : > { %1918 = vpow2.f32 %v1228_v6 }
 0x2b6   : > { %v1014_v7 = vpop.f32.mrf.mxu2  ;;  %v1103_v8 = vpop.f32.mrf.mxu3 }
 0x2b7   : > { %v1015_v9 = vadd.f32 %v1014_v7, %v2269_v22  ;;  %v1104_v10 = vadd.f32 %v1103_v8, %v2271_v23 }
 0x2b9   : > { %v1917_v11 = vpop.eup %1916  ;;  %v1230_v12 = vmul.f32 1.442695, %v1015_v9  ;;  %v1232_v13 = vmul.f32 1.442695, %v1104_v10 }
 0x2ba   : > { %v1919_v15 = vpop.eup %1918  ;;  %1294 = vst [vmem:[%s2282_s30 + $0x1e0] sm:$0xff] %v1917_v11 }
 0x2bb   : > { %1295 = vst [vmem:[%s2282_s30 + $0x1e8] sm:$0xff] %v1919_v15  ;;  %1920 = vpow2.f32 %v1230_v12 }
 0x2bc   : > { %1922 = vpow2.f32 %v1232_v13 }
 0x2c1   : > { %v1921_v22 = vpop.eup %1920 }
 0x2c2   : > { %v1923_v23 = vpop.eup %1922  ;;  %1296 = vst [vmem:[%s2282_s30 + $0x1f0] sm:$0xff] %v1921_v22 }
 0x2c3   : > { %1297 = vst [vmem:[%s2282_s30 + $0x1f8] sm:$0xff] %v1923_v23 }
 0x2c4   : > { %1951 = shalt.err (!%p1948_p5)
}
 0x2c5   : > { %s2004_s22 = smov 256   ;;  %s2005_s30 = smov 16  }
 0x2c6   : > { %1609 = dma.vmem_to_hbm [thread:$0]  (%p2086_p4), %s1315_s16, 8192, %s1317_s17, %s1299_s27, %s2004_s22, %s2004_s22, %s2005_s30  }
 0x2c7 PF: > { %p1615_p6 = scmp.ge.s32.totalorder %s2002_s29, 2  ;;  %s1331_s12 = sand.u32 1, %s1982_s24  }
 0x2c8   : > { %s1332_s15 = scalar_lea.sflag [#allocation3], %s1331_s12 }
 0x2c9   : > { %p1612_p7 = pnand %p1615_p6, %p2093_p8 }
 0x2cb   : > { %p1613_p9 = pneg %p1612_p7 }
 0x2cd   : > { %1977 = dma.done.wait (%p1613_p9), %s1332_s15, 8192  }
 0x2ce   : > { %1979 = vsyncadd (%p1613_p9), %s1332_s15, 4294959104  ;;  %s20_s29 = sadd.s32 1, %s2002_s29   ;;  %s2483_s24 = smov %s1986_s25 }
 0x2cf   : > { %p17_p10 = scmp.ge.s32.totalorder %s20_s29, 4   ;;  %s2484_s25 = smov %s1990_s26 }
 0x2d0   : > { %s2485_s26 = smov %s2099_s14  ;;  %s2486_s27 = smov %s1998_s28 }
 0x2d1   : > { %s2487_s28 = smov %s2489_s9  ;;  %19 = sbr.rel (!%p17_p10) target bundleno = 4 (0x4), region = 89 }
 0x2d6   :  { %1338 = vsyncpa [#allocation3], 1 }
 0x2d7   :  { %1340 = vsyncpa [#allocation3 + $0x1], 1 }

</bundles_post_ra>
